<compile_context>
chip_gen: v5e
topology: v5e:2x2
jax: 0.10.0
libtpu: 0.0.40
codegen_flags: <defaults>
</compile_context>

<pallas_src>
import functools

import jax
import jax.numpy as jnp
from jax import lax
from jax.experimental import pallas as pl
from jax.experimental.pallas import tpu as pltpu


def _proj_kernel(x_ref, w_ref, q_ref, k_ref, cumv_ref, carry_ref, tril_ref,
                 *, scale, d_out, d_pad):
    """Per sequence tile: fused QKV projection + running prefix-sum of V rows."""
    ts = x_ref.shape[0]

    @pl.when(pl.program_id(0) == 0)
    def _():
        carry_ref[...] = jnp.zeros_like(carry_ref)
        row = lax.broadcasted_iota(jnp.int32, (ts, ts), 0)
        col = lax.broadcasted_iota(jnp.int32, (ts, ts), 1)
        tril_ref[...] = (row >= col).astype(tril_ref.dtype)   # built once, reused

    # One fused projection: contract d_in against nn.Linear layout [3*d_pad, d_in].
    dn = (((1,), (1,)), ((), ()))
    qkv = lax.dot_general(x_ref[...], w_ref[...], dn,
                          preferred_element_type=jnp.float32)   # [ts, 3*d_pad] f32 acc
    q = qkv[:, :d_pad]
    k = qkv[:, d_pad:2 * d_pad]
    v = qkv[:, 2 * d_pad:]

    q_ref[...] = (q * scale).astype(q_ref.dtype)     # fold 1/sqrt(d_out) into Q once
    k_ref[...] = k.astype(k_ref.dtype)

    # Count column: v[:, d_out] := 1 so its prefix sum is the causal row count
    # (k+1).  The attention denominator then falls out of the same MXU pass as
    # the numerator in kernel 2 (the column sits in otherwise-zero padding).
    col_id = lax.broadcasted_iota(jnp.int32, v.shape, 1)
    v = jnp.where(col_id == d_out, 1.0, v)

    # Prefix sum of V rows: in-tile tril matmul + f32 cross-tile carry.
    carry = carry_ref[...]                           # [1, d_pad] f32
    local = jnp.dot(tril_ref[...], v.astype(tril_ref.dtype),
                    preferred_element_type=jnp.float32)
    cumv_ref[...] = (local + carry).astype(cumv_ref.dtype)
    carry_ref[...] = carry + jnp.sum(v, axis=0, keepdims=True)


def _attn_kernel(q_ref, k_ref, cumv_ref, o_ref, *, d_out):
    """Per query tile: out = (e @ cumV) / (e @ counts), e = exp(scores - max)."""
    dn = (((1,), (1,)), ((), ()))                    # q . k over features, no k.T copy
    s = lax.dot_general(q_ref[...], k_ref[...], dn,
                        preferred_element_type=jnp.float32)     # [tq, S] f32
    m = jnp.max(s, axis=-1, keepdims=True)
    e = jnp.exp(s - m)                               # f32 on the EUP; 1/sum(e) cancels

    num = jnp.dot(e.astype(cumv_ref.dtype), cumv_ref[...],
                  preferred_element_type=jnp.float32)           # [tq, d_pad] f32

    # Denominator = the count column of the SAME matmul (== e . (pos+1)).
    # 128-lane masked pick (guaranteed lowering) instead of an O(tq*S) reduce.
    col_id = lax.broadcasted_iota(jnp.int32, num.shape, 1)
    den = jnp.sum(jnp.where(col_id == d_out, num, 0.0), axis=-1, keepdims=True)

    inv = pl.reciprocal(den, approx=True)            # EUP slot
    inv = inv * (2.0 - den * inv)                    # one Newton step -> f32-accurate
    o_ref[...] = (num * inv).astype(o_ref.dtype)


def _vmem_limit_bytes():
    """Generation-aware scoped-VMEM limit with headroom under physical capacity."""
    try:
        cap = int(pltpu.get_tpu_info().vmem_capacity_bytes)
    except Exception:                                # conservative default
        cap = 64 << 20
    return min(112 << 20, max(32 << 20, cap - (16 << 20)))


def causal_attention(x, wq, wk, wv, *, compute_dtype=jnp.bfloat16,
                     tile_q=256, tile_s=256):
    """x: [S, d_in]; wq/wk/wv: nn.Linear weights [d_out, d_in]. Returns [S, d_out] f32."""
    S, d_in = x.shape
    d_out = wq.shape[0]
    scale = 1.0 / float(d_out) ** 0.5                # real d_out, not the padded one

    # Lane-dense N: pad d_out up to a multiple of 128 with at least one spare
    # column (column d_out carries the causal row counts for the denominator).
    d_pad = -(-(d_out + 1) // 128) * 128
    pad = ((0, d_pad - d_out), (0, 0))
    w = jnp.concatenate([jnp.pad(wq, pad), jnp.pad(wk, pad), jnp.pad(wv, pad)],
                        axis=0)                      # [3*d_pad, d_in]

    # Cast MXU operands once in the wrapper (also halves HBM traffic); all
    # accumulation and elementwise math stays f32 inside the kernels.
    x_c = x.astype(compute_dtype)
    w_c = w.astype(compute_dtype)

    # Defaults sized for v7x's 64 MiB VMEM; v5e/v6e can push toward 512.
    ts = min(tile_s, S)
    tq = min(tile_q, S)
    assert S % ts == 0 and S % tq == 0, "sequence length must divide the tile sizes"
    # TODO(synk): no ragged/tail path for sequence lengths not dividing the tiles.

    f32 = jnp.float32
    vmem_limit = _vmem_limit_bytes()
    params = lambda sem: pltpu.CompilerParams(
        dimension_semantics=sem, vmem_limit_bytes=vmem_limit)

    def run(single_buffer_resident):
        # Constant-index blocks (weights, resident K/cumV) don't need double
        # buffering -> halve their VMEM footprint.
        res = dict(pipeline_mode=pl.Buffered(1)) if single_buffer_resident else {}

        # ---- Kernel 1: fused QKV projection + prefix-sum of V (sequential carry). ----
        # TODO(synk): on v7x megacore the carry serializes this axis; a split
        # local-scan + tile-offset pass would let both TensorCores run it.
        q_s, k_s, cumv = pl.pallas_call(
            functools.partial(_proj_kernel, scale=scale, d_out=d_out, d_pad=d_pad),
            grid=(S // ts,),
            in_specs=[
                pl.BlockSpec((ts, d_in), lambda i: (i, 0)),
                pl.BlockSpec((3 * d_pad, d_in), lambda i: (0, 0), **res),
            ],
            out_specs=[
                pl.BlockSpec((ts, d_pad), lambda i: (i, 0)),
                pl.BlockSpec((ts, d_pad), lambda i: (i, 0)),
                pl.BlockSpec((ts, d_pad), lambda i: (i, 0)),
            ],
            out_shape=[jax.ShapeDtypeStruct((S, d_pad), compute_dtype)] * 3,
            scratch_shapes=[pltpu.VMEM((1, d_pad), f32),          # prefix carry
                            pltpu.VMEM((ts, ts), compute_dtype)], # hoisted tril
            compiler_params=params(("arbitrary",)),  # carry -> sequential axis
        )(x_c, w_c)

        # ---- Kernel 2: attention, parallel over query tiles (v7x megacore). ----
        # K and cumV stay VMEM-resident (single-buffered) across query tiles.
        # TODO(synk): for S where 2*S*d_pad*bytes overflows VMEM (v7x first),
        # add a key-tile grid axis with flash-style online max/rescale.
        out = pl.pallas_call(
            functools.partial(_attn_kernel, d_out=d_out),
            grid=(S // tq,),
            in_specs=[
                pl.BlockSpec((tq, d_pad), lambda i: (i, 0)),
                pl.BlockSpec((S, d_pad), lambda i: (0, 0), **res),
                pl.BlockSpec((S, d_pad), lambda i: (0, 0), **res),
            ],
            out_specs=pl.BlockSpec((tq, d_pad), lambda i: (i, 0)),
            out_shape=jax.ShapeDtypeStruct((S, d_pad), f32),
            compiler_params=params(("parallel",)),
        )(q_s, k_s, cumv)
        return out

    try:
        out = run(True)
    except Exception:
        # Fallback for runtimes where pipeline_mode=pl.Buffered(1) is not
        # lowerable: identical kernels with default double buffering.
        out = run(False)

    return out[:, :d_out]


def reference(x, wq, wk, wv):
    q = x @ wq.T
    k = x @ wk.T
    v = x @ wv.T
    scores = q @ k.T
    attn = jax.nn.softmax(scores / jnp.sqrt(jnp.float32(k.shape[-1])), axis=-1)
    S = scores.shape[0]
    tril = jnp.tril(jnp.ones((S, S), jnp.float32))
    masked = attn @ tril
    masked = masked / masked.sum(axis=-1, keepdims=True)
    return masked @ v


if __name__ == "__main__":
    S, d_in, d_out = 8, 32, 32
    key = jax.random.PRNGKey(0)
    kx, kq, kk, kv = jax.random.split(key, 4)

    x = jax.random.normal(kx, (S, d_in), dtype=jnp.float32)
    # nn.Linear(d_in, d_out, bias=False) weight shape: [d_out, d_in]
    bound = 1.0 / (d_in ** 0.5)
    wq = jax.random.uniform(kq, (d_out, d_in), jnp.float32, -bound, bound)
    wk = jax.random.uniform(kk, (d_out, d_in), jnp.float32, -bound, bound)
    wv = jax.random.uniform(kv, (d_out, d_in), jnp.float32, -bound, bound)

    ref = reference(x, wq, wk, wv)

    # Exact fp32 path: matches the fp32 PyTorch module within 1e-5.
    out_f32 = jax.block_until_ready(
        causal_attention(x, wq, wk, wv, compute_dtype=jnp.float32))
    assert out_f32.shape == (S, d_out)
    assert jnp.allclose(out_f32, ref, atol=1e-5, rtol=1e-5), \
        float(jnp.max(jnp.abs(out_f32 - ref)))

    # Fast path: bf16 MXU operands, f32 accumulation (default).
    out_bf16 = jax.block_until_ready(causal_attention(x, wq, wk, wv))
    assert out_bf16.shape == (S, d_out)
    assert jnp.allclose(out_bf16, ref, atol=5e-2, rtol=5e-2), \
        float(jnp.max(jnp.abs(out_bf16 - ref)))

    print("KERNEL_OK")
</pallas_src>

<mosaic_0001>
module attributes {stable_mosaic.version = 11 : i64} {
  func.func @_proj_kernel(%arg0: i32, %arg1: memref<8x32xf32, #tpu.memory_space<vmem>>, %arg2: memref<384x32xf32, #tpu.memory_space<vmem>>, %arg3: memref<8x128xf32, #tpu.memory_space<vmem>>, %arg4: memref<8x128xf32, #tpu.memory_space<vmem>>, %arg5: memref<8x128xf32, #tpu.memory_space<vmem>>, %arg6: memref<1x128xf32, #tpu.memory_space<vmem>>, %arg7: memref<8x8xf32, #tpu.memory_space<vmem>>) attributes {dimension_semantics = [#tpu.dimension_semantics<arbitrary>], iteration_bounds = array<i64: 1>, scalar_prefetch = 0 : i64, scratch_operands = 2 : i64, tpu.core_type = #tpu.core_type<tc>, window_params = [{transform_indices = @transform_0, window_bounds = array<i64: 8, 32>}, {pipeline_mode = #tpu.pipeline_mode<synchronous>, transform_indices = @transform_1, window_bounds = array<i64: 384, 32>}, {transform_indices = @transform_2, window_bounds = array<i64: 8, 128>}, {transform_indices = @transform_3, window_bounds = array<i64: 8, 128>}, {transform_indices = @transform_4, window_bounds = array<i64: 8, 128>}]} {
    %c0_i32 = arith.constant 0 : i32
    %0 = arith.cmpi eq, %arg0, %c0_i32 : i32
    %1 = arith.extui %0 : i1 to i32
    %c0_i32_0 = arith.constant 0 : i32
    %2 = arith.cmpi ne, %1, %c0_i32_0 : i32
    scf.if %2 {
      %cst_20 = arith.constant 0.000000e+00 : f32
      %28 = vector.broadcast %cst_20 : f32 to vector<1x128xf32>
      %c0_21 = arith.constant 0 : index
      %c0_22 = arith.constant 0 : index
      %29 = vector.load %arg6[%c0_21, %c0_22] : memref<1x128xf32, #tpu.memory_space<vmem>>, vector<1x128xf32>
      tpu.vector_store %arg6[%c0_21, %c0_22], %28 {strides = array<i32>} : memref<1x128xf32, #tpu.memory_space<vmem>>, vector<1x128xf32>,
      %30 = tpu.iota {dimensions = array<i32: 0>} : vector<8x8xi32>
      %31 = tpu.iota {dimensions = array<i32: 1>} : vector<8x8xi32>
      %32 = arith.cmpi sge, %30, %31 : vector<8x8xi32>
      %33 = arith.extui %32 : vector<8x8xi1> to vector<8x8xi32>
      %34 = arith.sitofp %33 : vector<8x8xi32> to vector<8x8xf32>
      %c0_23 = arith.constant 0 : index
      %c0_24 = arith.constant 0 : index
      %35 = vector.load %arg7[%c0_23, %c0_24] : memref<8x8xf32, #tpu.memory_space<vmem>>, vector<8x8xf32>
      tpu.vector_store %arg7[%c0_23, %c0_24], %34 {strides = array<i32>} : memref<8x8xf32, #tpu.memory_space<vmem>>, vector<8x8xf32>,
    } else {
    }
    %c0 = arith.constant 0 : index
    %c0_1 = arith.constant 0 : index
    %3 = vector.load %arg1[%c0, %c0_1] : memref<8x32xf32, #tpu.memory_space<vmem>>, vector<8x32xf32>
    %c0_2 = arith.constant 0 : index
    %c0_3 = arith.constant 0 : index
    %4 = vector.load %arg2[%c0_2, %c0_3] : memref<384x32xf32, #tpu.memory_space<vmem>>, vector<384x32xf32>
    %cst = arith.constant dense<0.000000e+00> : vector<8x384xf32>
    %5 = tpu.matmul %3, %4, %cst {dimension_numbers = #tpu.dot_dimension_numbers<[1], [1], [0], [0], [0, 0, 1, 0], [], []>} : vector<8x32xf32>, vector<384x32xf32>, vector<8x384xf32> -> vector<8x384xf32>
    %6 = vector.extract_strided_slice %5 {offsets = [0, 0], sizes = [8, 128], strides = [1, 1]} : vector<8x384xf32> to vector<8x128xf32>
    %7 = vector.extract_strided_slice %5 {offsets = [0, 128], sizes = [8, 128], strides = [1, 1]} : vector<8x384xf32> to vector<8x128xf32>
    %8 = vector.extract_strided_slice %5 {offsets = [0, 256], sizes = [8, 128], strides = [1, 1]} : vector<8x384xf32> to vector<8x128xf32>
    %cst_4 = arith.constant 0.176776692 : f32
    %9 = vector.broadcast %cst_4 : f32 to vector<8x128xf32>
    %10 = arith.mulf %6, %9 : vector<8x128xf32>
    %c0_5 = arith.constant 0 : index
    %c0_6 = arith.constant 0 : index
    %11 = vector.load %arg3[%c0_5, %c0_6] : memref<8x128xf32, #tpu.memory_space<vmem>>, vector<8x128xf32>
    tpu.vector_store %arg3[%c0_5, %c0_6], %10 {strides = array<i32>} : memref<8x128xf32, #tpu.memory_space<vmem>>, vector<8x128xf32>,
    %c0_7 = arith.constant 0 : index
    %c0_8 = arith.constant 0 : index
    %12 = vector.load %arg4[%c0_7, %c0_8] : memref<8x128xf32, #tpu.memory_space<vmem>>, vector<8x128xf32>
    tpu.vector_store %arg4[%c0_7, %c0_8], %7 {strides = array<i32>} : memref<8x128xf32, #tpu.memory_space<vmem>>, vector<8x128xf32>,
    %13 = tpu.iota {dimensions = array<i32: 1>} : vector<8x128xi32>
    %c32_i32 = arith.constant 32 : i32
    %14 = vector.broadcast %c32_i32 : i32 to vector<8x128xi32>
    %15 = arith.cmpi eq, %13, %14 : vector<8x128xi32>
    %cst_9 = arith.constant 1.000000e+00 : f32
    %16 = vector.broadcast %cst_9 : f32 to vector<8x128xf32>
    %17 = arith.select %15, %16, %8 : vector<8x128xi1>, vector<8x128xf32>
    %c0_10 = arith.constant 0 : index
    %c0_11 = arith.constant 0 : index
    %18 = vector.load %arg6[%c0_10, %c0_11] : memref<1x128xf32, #tpu.memory_space<vmem>>, vector<1x128xf32>
    %c0_12 = arith.constant 0 : index
    %c0_13 = arith.constant 0 : index
    %19 = vector.load %arg7[%c0_12, %c0_13] : memref<8x8xf32, #tpu.memory_space<vmem>>, vector<8x8xf32>
    %cst_14 = arith.constant dense<0.000000e+00> : vector<8x128xf32>
    %20 = tpu.matmul %19, %17, %cst_14 {dimension_numbers = #tpu.dot_dimension_numbers<[1], [0], [0], [1], [0, 0, 1, 1], [], []>} : vector<8x8xf32>, vector<8x128xf32>, vector<8x128xf32> -> vector<8x128xf32>
    %21 = vector.broadcast %18 : vector<1x128xf32> to vector<8x128xf32>
    %22 = arith.addf %20, %21 : vector<8x128xf32>
    %c0_15 = arith.constant 0 : index
    %c0_16 = arith.constant 0 : index
    %23 = vector.load %arg5[%c0_15, %c0_16] : memref<8x128xf32, #tpu.memory_space<vmem>>, vector<8x128xf32>
    tpu.vector_store %arg5[%c0_15, %c0_16], %22 {strides = array<i32>} : memref<8x128xf32, #tpu.memory_space<vmem>>, vector<8x128xf32>,
    %cst_17 = arith.constant dense<0.000000e+00> : vector<128xf32>
    %24 = vector.multi_reduction <add>, %17, %cst_17 [0] : vector<8x128xf32> to vector<128xf32>
    %25 = vector.shape_cast %24 : vector<128xf32> to vector<1x128xf32>
    %26 = arith.addf %18, %25 : vector<1x128xf32>
    %c0_18 = arith.constant 0 : index
    %c0_19 = arith.constant 0 : index
    %27 = vector.load %arg6[%c0_18, %c0_19] : memref<1x128xf32, #tpu.memory_space<vmem>>, vector<1x128xf32>
    tpu.vector_store %arg6[%c0_18, %c0_19], %26 {strides = array<i32>} : memref<1x128xf32, #tpu.memory_space<vmem>>, vector<1x128xf32>,
    return
  }
  func.func @transform_0(%arg0: i32) -> (i32, i32) {
    %c0_i32 = arith.constant 0 : i32
    %c0_i32_0 = arith.constant 0 : i32
    return %arg0, %c0_i32 : i32, i32
  }
  func.func @transform_1(%arg0: i32) -> (i32, i32) {
    %c0_i32 = arith.constant 0 : i32
    %c0_i32_0 = arith.constant 0 : i32
    %c0_i32_1 = arith.constant 0 : i32
    return %c0_i32, %c0_i32_0 : i32, i32
  }
  func.func @transform_2(%arg0: i32) -> (i32, i32) {
    %c0_i32 = arith.constant 0 : i32
    %c0_i32_0 = arith.constant 0 : i32
    return %arg0, %c0_i32 : i32, i32
  }
  func.func @transform_3(%arg0: i32) -> (i32, i32) {
    %c0_i32 = arith.constant 0 : i32
    %c0_i32_0 = arith.constant 0 : i32
    return %arg0, %c0_i32 : i32, i32
  }
  func.func @transform_4(%arg0: i32) -> (i32, i32) {
    %c0_i32 = arith.constant 0 : i32
    %c0_i32_0 = arith.constant 0 : i32
    return %arg0, %c0_i32 : i32, i32
  }
}

module attributes {stable_mosaic.version = 11 : i64} {
  func.func @_proj_kernel(%arg0: i32, %arg1: memref<8x32xf32, #tpu.memory_space<vmem>>, %arg2: memref<384x32xf32, #tpu.memory_space<vmem>>, %arg3: memref<8x128xf32, #tpu.memory_space<vmem>>, %arg4: memref<8x128xf32, #tpu.memory_space<vmem>>, %arg5: memref<8x128xf32, #tpu.memory_space<vmem>>, %arg6: memref<1x128xf32, #tpu.memory_space<vmem>>, %arg7: memref<8x8xf32, #tpu.memory_space<vmem>>) attributes {dimension_semantics = [#tpu.dimension_semantics<arbitrary>], iteration_bounds = array<i64: 1>, scalar_prefetch = 0 : i64, scratch_operands = 2 : i64, tpu.core_type = #tpu.core_type<tc>, window_params = [{transform_indices = @transform_0, window_bounds = array<i64: 8, 32>}, {pipeline_mode = #tpu.pipeline_mode<synchronous>, transform_indices = @transform_1, window_bounds = array<i64: 384, 32>}, {transform_indices = @transform_2, window_bounds = array<i64: 8, 128>}, {transform_indices = @transform_3, window_bounds = array<i64: 8, 128>}, {transform_indices = @transform_4, window_bounds = array<i64: 8, 128>}]} {
    %c0_i32 = arith.constant 0 : i32
    %0 = arith.cmpi eq, %arg0, %c0_i32 : i32
    %1 = arith.extui %0 : i1 to i32
    %c0_i32_0 = arith.constant 0 : i32
    %2 = arith.cmpi ne, %1, %c0_i32_0 : i32
    scf.if %2 {
      %cst_20 = arith.constant 0.000000e+00 : f32
      %28 = vector.broadcast %cst_20 : f32 to vector<1x128xf32>
      %c0_21 = arith.constant 0 : index
      %c0_22 = arith.constant 0 : index
      %29 = vector.load %arg6[%c0_21, %c0_22] : memref<1x128xf32, #tpu.memory_space<vmem>>, vector<1x128xf32>
      tpu.vector_store %arg6[%c0_21, %c0_22], %28 {strides = array<i32>} : memref<1x128xf32, #tpu.memory_space<vmem>>, vector<1x128xf32>,
      %30 = tpu.iota {dimensions = array<i32: 0>} : vector<8x8xi32>
      %31 = tpu.iota {dimensions = array<i32: 1>} : vector<8x8xi32>
      %32 = arith.cmpi sge, %30, %31 : vector<8x8xi32>
      %33 = arith.extui %32 : vector<8x8xi1> to vector<8x8xi32>
      %34 = arith.sitofp %33 : vector<8x8xi32> to vector<8x8xf32>
      %c0_23 = arith.constant 0 : index
      %c0_24 = arith.constant 0 : index
      %35 = vector.load %arg7[%c0_23, %c0_24] : memref<8x8xf32, #tpu.memory_space<vmem>>, vector<8x8xf32>
      tpu.vector_store %arg7[%c0_23, %c0_24], %34 {strides = array<i32>} : memref<8x8xf32, #tpu.memory_space<vmem>>, vector<8x8xf32>,
    } else {
    }
    %c0 = arith.constant 0 : index
    %c0_1 = arith.constant 0 : index
    %3 = vector.load %arg1[%c0, %c0_1] : memref<8x32xf32, #tpu.memory_space<vmem>>, vector<8x32xf32>
    %c0_2 = arith.constant 0 : index
    %c0_3 = arith.constant 0 : index
    %4 = vector.load %arg2[%c0_2, %c0_3] : memref<384x32xf32, #tpu.memory_space<vmem>>, vector<384x32xf32>
    %cst = arith.constant dense<0.000000e+00> : vector<8x384xf32>
    %5 = tpu.matmul %3, %4, %cst {dimension_numbers = #tpu.dot_dimension_numbers<[1], [1], [0], [0], [0, 0, 1, 0], [], []>} : vector<8x32xf32>, vector<384x32xf32>, vector<8x384xf32> -> vector<8x384xf32>
    %6 = vector.extract_strided_slice %5 {offsets = [0, 0], sizes = [8, 128], strides = [1, 1]} : vector<8x384xf32> to vector<8x128xf32>
    %7 = vector.extract_strided_slice %5 {offsets = [0, 128], sizes = [8, 128], strides = [1, 1]} : vector<8x384xf32> to vector<8x128xf32>
    %8 = vector.extract_strided_slice %5 {offsets = [0, 256], sizes = [8, 128], strides = [1, 1]} : vector<8x384xf32> to vector<8x128xf32>
    %cst_4 = arith.constant 0.176776692 : f32
    %9 = vector.broadcast %cst_4 : f32 to vector<8x128xf32>
    %10 = arith.mulf %6, %9 : vector<8x128xf32>
    %c0_5 = arith.constant 0 : index
    %c0_6 = arith.constant 0 : index
    %11 = vector.load %arg3[%c0_5, %c0_6] : memref<8x128xf32, #tpu.memory_space<vmem>>, vector<8x128xf32>
    tpu.vector_store %arg3[%c0_5, %c0_6], %10 {strides = array<i32>} : memref<8x128xf32, #tpu.memory_space<vmem>>, vector<8x128xf32>,
    %c0_7 = arith.constant 0 : index
    %c0_8 = arith.constant 0 : index
    %12 = vector.load %arg4[%c0_7, %c0_8] : memref<8x128xf32, #tpu.memory_space<vmem>>, vector<8x128xf32>
    tpu.vector_store %arg4[%c0_7, %c0_8], %7 {strides = array<i32>} : memref<8x128xf32, #tpu.memory_space<vmem>>, vector<8x128xf32>,
    %13 = tpu.iota {dimensions = array<i32: 1>} : vector<8x128xi32>
    %c32_i32 = arith.constant 32 : i32
    %14 = vector.broadcast %c32_i32 : i32 to vector<8x128xi32>
    %15 = arith.cmpi eq, %13, %14 : vector<8x128xi32>
    %cst_9 = arith.constant 1.000000e+00 : f32
    %16 = vector.broadcast %cst_9 : f32 to vector<8x128xf32>
    %17 = arith.select %15, %16, %8 : vector<8x128xi1>, vector<8x128xf32>
    %c0_10 = arith.constant 0 : index
    %c0_11 = arith.constant 0 : index
    %18 = vector.load %arg6[%c0_10, %c0_11] : memref<1x128xf32, #tpu.memory_space<vmem>>, vector<1x128xf32>
    %c0_12 = arith.constant 0 : index
    %c0_13 = arith.constant 0 : index
    %19 = vector.load %arg7[%c0_12, %c0_13] : memref<8x8xf32, #tpu.memory_space<vmem>>, vector<8x8xf32>
    %cst_14 = arith.constant dense<0.000000e+00> : vector<8x128xf32>
    %20 = tpu.matmul %19, %17, %cst_14 {dimension_numbers = #tpu.dot_dimension_numbers<[1], [0], [0], [1], [0, 0, 1, 1], [], []>} : vector<8x8xf32>, vector<8x128xf32>, vector<8x128xf32> -> vector<8x128xf32>
    %21 = vector.broadcast %18 : vector<1x128xf32> to vector<8x128xf32>
    %22 = arith.addf %20, %21 : vector<8x128xf32>
    %c0_15 = arith.constant 0 : index
    %c0_16 = arith.constant 0 : index
    %23 = vector.load %arg5[%c0_15, %c0_16] : memref<8x128xf32, #tpu.memory_space<vmem>>, vector<8x128xf32>
    tpu.vector_store %arg5[%c0_15, %c0_16], %22 {strides = array<i32>} : memref<8x128xf32, #tpu.memory_space<vmem>>, vector<8x128xf32>,
    %cst_17 = arith.constant dense<0.000000e+00> : vector<128xf32>
    %24 = vector.multi_reduction <add>, %17, %cst_17 [0] : vector<8x128xf32> to vector<128xf32>
    %25 = vector.shape_cast %24 : vector<128xf32> to vector<1x128xf32>
    %26 = arith.addf %18, %25 : vector<1x128xf32>
    %c0_18 = arith.constant 0 : index
    %c0_19 = arith.constant 0 : index
    %27 = vector.load %arg6[%c0_18, %c0_19] : memref<1x128xf32, #tpu.memory_space<vmem>>, vector<1x128xf32>
    tpu.vector_store %arg6[%c0_18, %c0_19], %26 {strides = array<i32>} : memref<1x128xf32, #tpu.memory_space<vmem>>, vector<1x128xf32>,
    return
  }
  func.func @transform_0(%arg0: i32) -> (i32, i32) {
    %c0_i32 = arith.constant 0 : i32
    %c0_i32_0 = arith.constant 0 : i32
    return %arg0, %c0_i32 : i32, i32
  }
  func.func @transform_1(%arg0: i32) -> (i32, i32) {
    %c0_i32 = arith.constant 0 : i32
    %c0_i32_0 = arith.constant 0 : i32
    %c0_i32_1 = arith.constant 0 : i32
    return %c0_i32, %c0_i32_0 : i32, i32
  }
  func.func @transform_2(%arg0: i32) -> (i32, i32) {
    %c0_i32 = arith.constant 0 : i32
    %c0_i32_0 = arith.constant 0 : i32
    return %arg0, %c0_i32 : i32, i32
  }
  func.func @transform_3(%arg0: i32) -> (i32, i32) {
    %c0_i32 = arith.constant 0 : i32
    %c0_i32_0 = arith.constant 0 : i32
    return %arg0, %c0_i32 : i32, i32
  }
  func.func @transform_4(%arg0: i32) -> (i32, i32) {
    %c0_i32 = arith.constant 0 : i32
    %c0_i32_0 = arith.constant 0 : i32
    return %arg0, %c0_i32 : i32, i32
  }
}

</mosaic_0001>

<bundles_post_ra>
// kernel: tpu_custom_call.1
= control target key start
LH: loop header
LB: loop body
LE: loop exit
PB: predicated region body
PF: predicated region fallthrough
CT: control target
= control target key end

     0   :  { %10 = vsyncpa [#allocation5], 0  ;;  %vm79_vm0 = vcmask 261120   ;;  %s751_s0 = inlined_call_operand.vmem [shape: f32[8,32], index: 0, kind: input, shape index: {}]   ;;  %s752_s1 = inlined_call_operand.vmem [shape: f32[384,32], index: 1, kind: input, shape index: {}]   ;;  %s753_s2 = inlined_call_operand.hbm [shape: f32[8,128], index: 2, kind: output, shape index: {0}]   ;;  %s754_s3 = inlined_call_operand.hbm [shape: f32[8,128], index: 3, kind: output, shape index: {1}]   ;;  %s755_s4 = inlined_call_operand.hbm [shape: f32[8,128], index: 4, kind: output, shape index: {2}]  }
   0x1   :  { %v78_v0 = vld [vmem:[%s752_s1 + $0x178] sm:$0xff]  ;;  %v77_v1 = vld [vmem:[%s752_s1 + $0x170] sm:$0xff] }
   0x2   :  { %414 = vmatpush.xpose.msk.msra.mxu2 %vm79_vm0, %v78_v0 }
   0x3   :  { %11 = vsyncpa [#allocation7], 0  ;;  %v76_v2 = vld [vmem:[%s752_s1 + $0x168] sm:$0xff]  ;;  %v75_v3 = vld [vmem:[%s752_s1 + $0x160] sm:$0xff]  ;;  %v21_v45 = vlaneseq  ;;  %v513_v48 = vmov 0.0   ;;  %vm28_vm2 = vcmask 64512  }
   0x4   :  { %v74_v4 = vld [vmem:[%s752_s1 + $0x158] sm:$0xff]  ;;  %v73_v5 = vld [vmem:[%s752_s1 + $0x150] sm:$0xff]  ;;  %v72_v6 = vld [vmem:[%s752_s1 + $0x148] sm:$0xff]  ;;  %20 = vst [vmem:[#allocation2] sm:$0x1] %v513_v48  ;;  %s350_s10 = sshll.u32 %s754_s3, 4  ;;  %s351_s10 = int_to_ptr.hbm [resolvable:$true] %s350_s10 }
   0x5   :  { %v71_v7 = vld [vmem:[%s752_s1 + $0x140] sm:$0xff]  ;;  %v70_v8 = vld [vmem:[%s752_s1 + $0x138] sm:$0xff]  ;;  %v69_v11 = vld [vmem:[%s752_s1 + $0x130] sm:$0xff]  ;;  %v24_v46 = vand.u32 127, %v21_v45  ;;  %v22_v47 = vshrl.u32 %v21_v45, 7  ;;  %s515_s11 = smov [#allocation4]  }
   0x6   :  { %415 = vmatpush.xpose.msk.msra.mxu2 %vm79_vm0, %v77_v1  ;;  %v46_v9 = vld [vmem:[%s752_s1 + $0x78] sm:$0xff]  ;;  %v45_v12 = vld [vmem:[%s752_s1 + $0x70] sm:$0xff]  ;;  %v68_v14 = vld [vmem:[%s752_s1 + $0x128] sm:$0xff]  ;;  %s337_s12 = sshll.u32 %s515_s11, 4  ;;  %s339_s15 = sshll.u32 %s753_s2, 4  ;;  %s338_s12 = int_to_ptr.vmem [resolvable:$true] %s337_s12  ;;  %s340_s15 = int_to_ptr.hbm [resolvable:$true] %s339_s15 }
   0x7   :  { %v62_v10 = vld [vmem:[%s752_s1 + $0xf8] sm:$0xff]  ;;  %380 = vmatpush.xpose.msk.msra.mxu0 %vm79_vm0, %v46_v9  ;;  %v61_v13 = vld [vmem:[%s752_s1 + $0xf0] sm:$0xff]  ;;  %v44_v15 = vld [vmem:[%s752_s1 + $0x68] sm:$0xff]  ;;  %vm25_vm1 = vcmp.ge.s32.totalorder %v22_v47, %v24_v46  ;;  %vm292_vm3 = vcmp.eq.s32.totalorder %v24_v46, 32  ;;  %s516_s16 = smov [#allocation8]   ;;  %s361_s19 = sshll.u32 %s755_s4, 4  ;;  %s362_s19 = int_to_ptr.hbm [resolvable:$true] %s361_s19 }
   0x8   :  { %397 = vmatpush.xpose.msk.msra.mxu1 %vm79_vm0, %v62_v10  ;;  %v60_v16 = vld [vmem:[%s752_s1 + $0xe8] sm:$0xff]  ;;  %v67_v17 = vld [vmem:[%s752_s1 + $0x120] sm:$0xff]  ;;  %v66_v20 = vld [vmem:[%s752_s1 + $0x118] sm:$0xff]  ;;  %v379_v49 = vsel %vm25_vm1, 1.0, %v513_v48  ;;  %s359_s17 = sshll.u32 %s516_s16, 4  ;;  %s360_s17 = int_to_ptr.vmem [resolvable:$true] %s359_s17 }
   0x9   :  { %v43_v18 = vld [vmem:[%s752_s1 + $0x60] sm:$0xff]  ;;  %v42_v21 = vld [vmem:[%s752_s1 + $0x58] sm:$0xff]  ;;  %v65_v23 = vld [vmem:[%s752_s1 + $0x110] sm:$0xff]  ;;  %29 = vst.msk [vmem:[#allocation3] sm:$0xff] %vm28_vm2, %v379_v49 }
   0xa   :  { %416 = vmatpush.xpose.msk.msra.mxu2 %vm79_vm0, %v76_v2  ;;  %v59_v19 = vld [vmem:[%s752_s1 + $0xe0] sm:$0xff]  ;;  %v58_v22 = vld [vmem:[%s752_s1 + $0xd8] sm:$0xff]  ;;  %v41_v24 = vld [vmem:[%s752_s1 + $0x50] sm:$0xff] }
   0xb   :  { %381 = vmatpush.xpose.msk.msra.mxu0 %vm79_vm0, %v45_v12  ;;  %v57_v25 = vld [vmem:[%s752_s1 + $0xd0] sm:$0xff]  ;;  %v64_v26 = vld [vmem:[%s752_s1 + $0x108] sm:$0xff]  ;;  %v63_v29 = vld [vmem:[%s752_s1 + $0x100] sm:$0xff] }
   0xc   :  { %398 = vmatpush.xpose.msk.msra.mxu1 %vm79_vm0, %v61_v13  ;;  %v40_v27 = vld [vmem:[%s752_s1 + $0x48] sm:$0xff]  ;;  %v39_v30 = vld [vmem:[%s752_s1 + $0x40] sm:$0xff]  ;;  %v38_v33 = vld [vmem:[%s752_s1 + $0x38] sm:$0xff] }
   0xd   :  { %v56_v28 = vld [vmem:[%s752_s1 + $0xc8] sm:$0xff]  ;;  %v55_v31 = vld [vmem:[%s752_s1 + $0xc0] sm:$0xff]  ;;  %v54_v34 = vld [vmem:[%s752_s1 + $0xb8] sm:$0xff] }
   0xe   :  { %417 = vmatpush.xpose.msk.msra.mxu2 %vm79_vm0, %v75_v3  ;;  %v30_v32 = vld [vmem:[%s751_s0] sm:$0xff]  ;;  %v37_v35 = vld [vmem:[%s752_s1 + $0x30] sm:$0xff]  ;;  %v36_v37 = vld [vmem:[%s752_s1 + $0x28] sm:$0xff] }
   0xf   :  { %382 = vmatpush.xpose.msk.msra.mxu0 %vm79_vm0, %v44_v15  ;;  %v53_v36 = vld [vmem:[%s752_s1 + $0xb0] sm:$0xff]  ;;  %v52_v38 = vld [vmem:[%s752_s1 + $0xa8] sm:$0xff]  ;;  %v35_v39 = vld [vmem:[%s752_s1 + $0x20] sm:$0xff] }
  0x10   :  { %399 = vmatpush.xpose.msk.msra.mxu1 %vm79_vm0, %v60_v16  ;;  %v51_v40 = vld [vmem:[%s752_s1 + $0xa0] sm:$0xff]  ;;  %v34_v41 = vld [vmem:[%s752_s1 + $0x18] sm:$0xff]  ;;  %v33_v43 = vld [vmem:[%s752_s1 + $0x10] sm:$0xff] }
  0x11   :  { %v50_v42 = vld [vmem:[%s752_s1 + $0x98] sm:$0xff]  ;;  %v49_v44 = vld [vmem:[%s752_s1 + $0x90] sm:$0xff]  ;;  %v32_v50 = vld [vmem:[%s752_s1 + $0x8] sm:$0xff] }
  0x12   :  { %418 = vmatpush.xpose.msk.msra.mxu2 %vm79_vm0, %v74_v4  ;;  %v48_v51 = vld [vmem:[%s752_s1 + $0x88] sm:$0xff]  ;;  %v31_v52 = vld [vmem:[%s752_s1] sm:$0xff] }
  0x13   :  { %383 = vmatpush.xpose.msk.msra.mxu0 %vm79_vm0, %v43_v18  ;;  %v47_v53 = vld [vmem:[%s752_s1 + $0x80] sm:$0xff]  ;;  %s514_s1 = smov [#allocation6]  }
  0x14   :  { %400 = vmatpush.xpose.msk.msra.mxu1 %vm79_vm0, %v59_v19  ;;  %v295_v55 = vld [vmem:[#allocation3] sm:$0xff]  ;;  %v294_v62 = vld [vmem:[#allocation2] sm:$0x1]  ;;  %s348_s0 = sshll.u32 %s514_s1, 4  ;;  %s349_s0 = int_to_ptr.vmem [resolvable:$true] %s348_s0 }
  0x15   :  { %v436_v0 = vld [vmem:[#allocation2] ss:$0 sm:$0xff] }
  0x16   :  { %419 = vmatpush.xpose.msk.msra.mxu2 %vm79_vm0, %v73_v5 }
  0x17   :  { %384 = vmatpush.xpose.msk.msra.mxu0 %vm79_vm0, %v42_v21 }
  0x18   :  { %401 = vmatpush.xpose.msk.msra.mxu1 %vm79_vm0, %v58_v22 }
  0x1a   :  { %420 = vmatpush.xpose.msk.msra.mxu2 %vm79_vm0, %v72_v6 }
  0x1b   :  { %385 = vmatpush.xpose.msk.msra.mxu0 %vm79_vm0, %v41_v24 }
  0x1c   :  { %402 = vmatpush.xpose.msk.msra.mxu1 %vm79_vm0, %v57_v25 }
  0x1e   :  { %421 = vmatpush.xpose.msk.msra.mxu2 %vm79_vm0, %v71_v7 }
  0x1f   :  { %386 = vmatpush.xpose.msk.msra.mxu0 %vm79_vm0, %v40_v27 }
  0x20   :  { %403 = vmatpush.xpose.msk.msra.mxu1 %vm79_vm0, %v56_v28 }
  0x22   :  { %422 = vmatpush.xpose.msk.msra.mxu2 %vm79_vm0, %v70_v8 }
  0x23   :  { %387 = vmatpush.xpose.msk.msra.mxu0 %vm79_vm0, %v39_v30 }
  0x24   :  { %404 = vmatpush.xpose.msk.msra.mxu1 %vm79_vm0, %v55_v31 }
  0x26   :  { %423 = vmatpush.xpose.msk.msra.mxu2 %vm79_vm0, %v69_v11 }
  0x27   :  { %388 = vmatpush.xpose.msk.msra.mxu0 %vm79_vm0, %v38_v33 }
  0x28   :  { %405 = vmatpush.xpose.msk.msra.mxu1 %vm79_vm0, %v54_v34 }
  0x2a   :  { %424 = vmatpush.xpose.msk.msra.mxu2 %vm79_vm0, %v68_v14 }
  0x2b   :  { %389 = vmatpush.xpose.msk.msra.mxu0 %vm79_vm0, %v37_v35 }
  0x2c   :  { %406 = vmatpush.xpose.msk.msra.mxu1 %vm79_vm0, %v53_v36 }
  0x2e   :  { %425 = vmatpush.xpose.msk.msra.mxu2 %vm79_vm0, %v67_v17 }
  0x2f   :  { %390 = vmatpush.xpose.msk.msra.mxu0 %vm79_vm0, %v36_v37 }
  0x30   :  { %407 = vmatpush.xpose.msk.msra.mxu1 %vm79_vm0, %v52_v38 }
  0x32   :  { %426 = vmatpush.xpose.msk.msra.mxu2 %vm79_vm0, %v66_v20 }
  0x33   :  { %391 = vmatpush.xpose.msk.msra.mxu0 %vm79_vm0, %v35_v39 }
  0x34   :  { %408 = vmatpush.xpose.msk.msra.mxu1 %vm79_vm0, %v51_v40 }
  0x36   :  { %427 = vmatpush.xpose.msk.msra.mxu2 %vm79_vm0, %v65_v23 }
  0x37   :  { %392 = vmatpush.xpose.msk.msra.mxu0 %vm79_vm0, %v34_v41 }
  0x38   :  { %409 = vmatpush.xpose.msk.msra.mxu1 %vm79_vm0, %v50_v42 }
  0x3a   :  { %428 = vmatpush.xpose.msk.msra.mxu2 %vm79_vm0, %v64_v26 }
  0x3b   :  { %393 = vmatpush.xpose.msk.msra.mxu0 %vm79_vm0, %v33_v43 }
  0x3c   :  { %410 = vmatpush.xpose.msk.msra.mxu1 %vm79_vm0, %v49_v44 }
  0x3e   :  { %429 = vmatpush.xpose.msk.msra.mxu2 %vm79_vm0, %v63_v29 }
  0x3f   :  { %394 = vmatpush.xpose.msk.msra.mxu0 %vm79_vm0, %v32_v50 }
  0x40   :  { %411 = vmatpush.xpose.msk.msra.mxu1 %vm79_vm0, %v48_v51 }
  0x41   :  { %430 = vmatmul.msk.f32.vlgmr.msra.gmra.mxu2 %vm79_vm0, %v30_v32 }
  0x43   :  { %395 = vmatpush.xpose.msk.msra.mxu0 %vm79_vm0, %v31_v52 }
  0x44   :  { %412 = vmatpush.xpose.msk.msra.mxu1 %vm79_vm0, %v47_v53 }
  0x46   :  { %396 = vmatmul.msk.f32.vlgmr.msra.gmra.mxu0 %vm79_vm0, %v30_v32 }
  0x47   :  { %413 = vmatmul.msk.f32.vlgmr.msra.gmra.mxu1 %vm79_vm0, %v30_v32 }
  0xc3   :  { %v244_v2 = vpop.f32.mrf.mxu0 }
  0xc4   :  { %v284_v54 = vpop.f32.mrf.mxu2  ;;  %v287_v3 = vmul.f32 0.17677669, %v244_v2  ;;  %v264_v4 = vpop.f32.mrf.mxu1 }
  0xc5   :  { %v293_v56 = vsel %vm292_vm3, 1.0, %v284_v54  ;;  %289 = vst [vmem:[#allocation6] sm:$0xff] %v264_v4 }
  0xc6   :  { %v324_v57 = vrot.slane %v293_v56, 4  ;;  %318 = vmatpush.msra.mxu3 %v293_v56  ;;  %288 = vst [vmem:[#allocation4] sm:$0xff] %v287_v3  ;;  %353 = dma.vmem_to_hbm [thread:$0]  %s349_s0, 128, %s351_s10, [#allocation7]  }
  0xc7   :  { %431 = vmatmul.msk.f32.vlgmr.msra.gmra.mxu3 %vm28_vm2, %v295_v55  ;;  %342 = dma.vmem_to_hbm [thread:$0]  %s338_s12, 128, %s340_s15, [#allocation5]  }
  0xc8   :  { %v325_v58 = vadd.f32 %v324_v57, %v293_v56 }
  0xca   :  { %v326_v59 = vrot.slane %v325_v58, 2 }
  0xcc   :  { %v327_v60 = vadd.f32 %v326_v59, %v325_v58 }
  0xce   :  { %v328_v61 = vrot.slane %v327_v60, 1 }
  0xd0   :  { %v329_v63 = vadd.f32 %v328_v61, %v327_v60 }
  0xd2   :  { %v330_v1 = vadd.f32 %v329_v63, %v294_v62 }
  0xd4   :  { %331 = vst [vmem:[#allocation2] sm:$0x1] %v330_v1 }
 0x14a   :  { %v320_v5 = vpop.f32.mrf.mxu3 }
 0x14b   :  { %v321_v6 = vadd.f32 %v436_v0, %v320_v5 }
 0x14d   :  { %323 = vst [vmem:[#allocation8] sm:$0xff] %v321_v6 }
 0x14e   :  { %364 = dma.vmem_to_hbm [thread:$0]  %s360_s17, 128, %s362_s19, [#allocation7]  }
 0x14f   :  { %509 = dma.done.wait [#allocation5], 128  }
 0x150   :  { %510 = vsyncadd [#allocation5], 4294967168 }
 0x151   :  { %511 = dma.done.wait [#allocation7], 256  }
 0x152   :  { %512 = vsyncadd [#allocation7], 4294967040 }
 0x153   :  { %377 = vsyncpa [#allocation5], 1 }
 0x154   :  { %378 = vsyncpa [#allocation7], 1 }

// kernel: tpu_custom_call.1
= control target key start
LH: loop header
LB: loop body
LE: loop exit
PB: predicated region body
PF: predicated region fallthrough
CT: control target
= control target key end

     0   :  { %10 = vsyncpa [#allocation5], 0  ;;  %vm79_vm0 = vcmask 261120   ;;  %s751_s0 = inlined_call_operand.vmem [shape: f32[8,32], index: 0, kind: input, shape index: {}]   ;;  %s752_s1 = inlined_call_operand.vmem [shape: f32[384,32], index: 1, kind: input, shape index: {}]   ;;  %s753_s2 = inlined_call_operand.hbm [shape: f32[8,128], index: 2, kind: output, shape index: {0}]   ;;  %s754_s3 = inlined_call_operand.hbm [shape: f32[8,128], index: 3, kind: output, shape index: {1}]   ;;  %s755_s4 = inlined_call_operand.hbm [shape: f32[8,128], index: 4, kind: output, shape index: {2}]  }
   0x1   :  { %v78_v0 = vld [vmem:[%s752_s1 + $0x178] sm:$0xff]  ;;  %v77_v1 = vld [vmem:[%s752_s1 + $0x170] sm:$0xff] }
   0x2   :  { %414 = vmatpush.xpose.msk.msra.mxu2 %vm79_vm0, %v78_v0 }
   0x3   :  { %11 = vsyncpa [#allocation7], 0  ;;  %v76_v2 = vld [vmem:[%s752_s1 + $0x168] sm:$0xff]  ;;  %v75_v3 = vld [vmem:[%s752_s1 + $0x160] sm:$0xff]  ;;  %v21_v45 = vlaneseq  ;;  %v513_v48 = vmov 0.0   ;;  %vm28_vm2 = vcmask 64512  }
   0x4   :  { %v74_v4 = vld [vmem:[%s752_s1 + $0x158] sm:$0xff]  ;;  %v73_v5 = vld [vmem:[%s752_s1 + $0x150] sm:$0xff]  ;;  %v72_v6 = vld [vmem:[%s752_s1 + $0x148] sm:$0xff]  ;;  %20 = vst [vmem:[#allocation2] sm:$0x1] %v513_v48  ;;  %s350_s10 = sshll.u32 %s754_s3, 4  ;;  %s351_s10 = int_to_ptr.hbm [resolvable:$true] %s350_s10 }
   0x5   :  { %v71_v7 = vld [vmem:[%s752_s1 + $0x140] sm:$0xff]  ;;  %v70_v8 = vld [vmem:[%s752_s1 + $0x138] sm:$0xff]  ;;  %v69_v11 = vld [vmem:[%s752_s1 + $0x130] sm:$0xff]  ;;  %v24_v46 = vand.u32 127, %v21_v45  ;;  %v22_v47 = vshrl.u32 %v21_v45, 7  ;;  %s515_s11 = smov [#allocation4]  }
   0x6   :  { %415 = vmatpush.xpose.msk.msra.mxu2 %vm79_vm0, %v77_v1  ;;  %v46_v9 = vld [vmem:[%s752_s1 + $0x78] sm:$0xff]  ;;  %v45_v12 = vld [vmem:[%s752_s1 + $0x70] sm:$0xff]  ;;  %v68_v14 = vld [vmem:[%s752_s1 + $0x128] sm:$0xff]  ;;  %s337_s12 = sshll.u32 %s515_s11, 4  ;;  %s339_s15 = sshll.u32 %s753_s2, 4  ;;  %s338_s12 = int_to_ptr.vmem [resolvable:$true] %s337_s12  ;;  %s340_s15 = int_to_ptr.hbm [resolvable:$true] %s339_s15 }
   0x7   :  { %v62_v10 = vld [vmem:[%s752_s1 + $0xf8] sm:$0xff]  ;;  %380 = vmatpush.xpose.msk.msra.mxu0 %vm79_vm0, %v46_v9  ;;  %v61_v13 = vld [vmem:[%s752_s1 + $0xf0] sm:$0xff]  ;;  %v44_v15 = vld [vmem:[%s752_s1 + $0x68] sm:$0xff]  ;;  %vm25_vm1 = vcmp.ge.s32.totalorder %v22_v47, %v24_v46  ;;  %vm292_vm3 = vcmp.eq.s32.totalorder %v24_v46, 32  ;;  %s516_s16 = smov [#allocation8]   ;;  %s361_s19 = sshll.u32 %s755_s4, 4  ;;  %s362_s19 = int_to_ptr.hbm [resolvable:$true] %s361_s19 }
   0x8   :  { %397 = vmatpush.xpose.msk.msra.mxu1 %vm79_vm0, %v62_v10  ;;  %v60_v16 = vld [vmem:[%s752_s1 + $0xe8] sm:$0xff]  ;;  %v67_v17 = vld [vmem:[%s752_s1 + $0x120] sm:$0xff]  ;;  %v66_v20 = vld [vmem:[%s752_s1 + $0x118] sm:$0xff]  ;;  %v379_v49 = vsel %vm25_vm1, 1.0, %v513_v48  ;;  %s359_s17 = sshll.u32 %s516_s16, 4  ;;  %s360_s17 = int_to_ptr.vmem [resolvable:$true] %s359_s17 }
   0x9   :  { %v43_v18 = vld [vmem:[%s752_s1 + $0x60] sm:$0xff]  ;;  %v42_v21 = vld [vmem:[%s752_s1 + $0x58] sm:$0xff]  ;;  %v65_v23 = vld [vmem:[%s752_s1 + $0x110] sm:$0xff]  ;;  %29 = vst.msk [vmem:[#allocation3] sm:$0xff] %vm28_vm2, %v379_v49 }
   0xa   :  { %416 = vmatpush.xpose.msk.msra.mxu2 %vm79_vm0, %v76_v2  ;;  %v59_v19 = vld [vmem:[%s752_s1 + $0xe0] sm:$0xff]  ;;  %v58_v22 = vld [vmem:[%s752_s1 + $0xd8] sm:$0xff]  ;;  %v41_v24 = vld [vmem:[%s752_s1 + $0x50] sm:$0xff] }
   0xb   :  { %381 = vmatpush.xpose.msk.msra.mxu0 %vm79_vm0, %v45_v12  ;;  %v57_v25 = vld [vmem:[%s752_s1 + $0xd0] sm:$0xff]  ;;  %v64_v26 = vld [vmem:[%s752_s1 + $0x108] sm:$0xff]  ;;  %v63_v29 = vld [vmem:[%s752_s1 + $0x100] sm:$0xff] }
   0xc   :  { %398 = vmatpush.xpose.msk.msra.mxu1 %vm79_vm0, %v61_v13  ;;  %v40_v27 = vld [vmem:[%s752_s1 + $0x48] sm:$0xff]  ;;  %v39_v30 = vld [vmem:[%s752_s1 + $0x40] sm:$0xff]  ;;  %v38_v33 = vld [vmem:[%s752_s1 + $0x38] sm:$0xff] }
   0xd   :  { %v56_v28 = vld [vmem:[%s752_s1 + $0xc8] sm:$0xff]  ;;  %v55_v31 = vld [vmem:[%s752_s1 + $0xc0] sm:$0xff]  ;;  %v54_v34 = vld [vmem:[%s752_s1 + $0xb8] sm:$0xff] }
   0xe   :  { %417 = vmatpush.xpose.msk.msra.mxu2 %vm79_vm0, %v75_v3  ;;  %v30_v32 = vld [vmem:[%s751_s0] sm:$0xff]  ;;  %v37_v35 = vld [vmem:[%s752_s1 + $0x30] sm:$0xff]  ;;  %v36_v37 = vld [vmem:[%s752_s1 + $0x28] sm:$0xff] }
   0xf   :  { %382 = vmatpush.xpose.msk.msra.mxu0 %vm79_vm0, %v44_v15  ;;  %v53_v36 = vld [vmem:[%s752_s1 + $0xb0] sm:$0xff]  ;;  %v52_v38 = vld [vmem:[%s752_s1 + $0xa8] sm:$0xff]  ;;  %v35_v39 = vld [vmem:[%s752_s1 + $0x20] sm:$0xff] }
  0x10   :  { %399 = vmatpush.xpose.msk.msra.mxu1 %vm79_vm0, %v60_v16  ;;  %v51_v40 = vld [vmem:[%s752_s1 + $0xa0] sm:$0xff]  ;;  %v34_v41 = vld [vmem:[%s752_s1 + $0x18] sm:$0xff]  ;;  %v33_v43 = vld [vmem:[%s752_s1 + $0x10] sm:$0xff] }
  0x11   :  { %v50_v42 = vld [vmem:[%s752_s1 + $0x98] sm:$0xff]  ;;  %v49_v44 = vld [vmem:[%s752_s1 + $0x90] sm:$0xff]  ;;  %v32_v50 = vld [vmem:[%s752_s1 + $0x8] sm:$0xff] }
  0x12   :  { %418 = vmatpush.xpose.msk.msra.mxu2 %vm79_vm0, %v74_v4  ;;  %v48_v51 = vld [vmem:[%s752_s1 + $0x88] sm:$0xff]  ;;  %v31_v52 = vld [vmem:[%s752_s1] sm:$0xff] }
  0x13   :  { %383 = vmatpush.xpose.msk.msra.mxu0 %vm79_vm0, %v43_v18  ;;  %v47_v53 = vld [vmem:[%s752_s1 + $0x80] sm:$0xff]  ;;  %s514_s1 = smov [#allocation6]  }
  0x14   :  { %400 = vmatpush.xpose.msk.msra.mxu1 %vm79_vm0, %v59_v19  ;;  %v295_v55 = vld [vmem:[#allocation3] sm:$0xff]  ;;  %v294_v62 = vld [vmem:[#allocation2] sm:$0x1]  ;;  %s348_s0 = sshll.u32 %s514_s1, 4  ;;  %s349_s0 = int_to_ptr.vmem [resolvable:$true] %s348_s0 }
  0x15   :  { %v436_v0 = vld [vmem:[#allocation2] ss:$0 sm:$0xff] }
  0x16   :  { %419 = vmatpush.xpose.msk.msra.mxu2 %vm79_vm0, %v73_v5 }
  0x17   :  { %384 = vmatpush.xpose.msk.msra.mxu0 %vm79_vm0, %v42_v21 }
  0x18   :  { %401 = vmatpush.xpose.msk.msra.mxu1 %vm79_vm0, %v58_v22 }
  0x1a   :  { %420 = vmatpush.xpose.msk.msra.mxu2 %vm79_vm0, %v72_v6 }
  0x1b   :  { %385 = vmatpush.xpose.msk.msra.mxu0 %vm79_vm0, %v41_v24 }
  0x1c   :  { %402 = vmatpush.xpose.msk.msra.mxu1 %vm79_vm0, %v57_v25 }
  0x1e   :  { %421 = vmatpush.xpose.msk.msra.mxu2 %vm79_vm0, %v71_v7 }
  0x1f   :  { %386 = vmatpush.xpose.msk.msra.mxu0 %vm79_vm0, %v40_v27 }
  0x20   :  { %403 = vmatpush.xpose.msk.msra.mxu1 %vm79_vm0, %v56_v28 }
  0x22   :  { %422 = vmatpush.xpose.msk.msra.mxu2 %vm79_vm0, %v70_v8 }
  0x23   :  { %387 = vmatpush.xpose.msk.msra.mxu0 %vm79_vm0, %v39_v30 }
  0x24   :  { %404 = vmatpush.xpose.msk.msra.mxu1 %vm79_vm0, %v55_v31 }
  0x26   :  { %423 = vmatpush.xpose.msk.msra.mxu2 %vm79_vm0, %v69_v11 }
  0x27   :  { %388 = vmatpush.xpose.msk.msra.mxu0 %vm79_vm0, %v38_v33 }
  0x28   :  { %405 = vmatpush.xpose.msk.msra.mxu1 %vm79_vm0, %v54_v34 }
  0x2a   :  { %424 = vmatpush.xpose.msk.msra.mxu2 %vm79_vm0, %v68_v14 }
  0x2b   :  { %389 = vmatpush.xpose.msk.msra.mxu0 %vm79_vm0, %v37_v35 }
  0x2c   :  { %406 = vmatpush.xpose.msk.msra.mxu1 %vm79_vm0, %v53_v36 }
  0x2e   :  { %425 = vmatpush.xpose.msk.msra.mxu2 %vm79_vm0, %v67_v17 }
  0x2f   :  { %390 = vmatpush.xpose.msk.msra.mxu0 %vm79_vm0, %v36_v37 }
  0x30   :  { %407 = vmatpush.xpose.msk.msra.mxu1 %vm79_vm0, %v52_v38 }
  0x32   :  { %426 = vmatpush.xpose.msk.msra.mxu2 %vm79_vm0, %v66_v20 }
  0x33   :  { %391 = vmatpush.xpose.msk.msra.mxu0 %vm79_vm0, %v35_v39 }
  0x34   :  { %408 = vmatpush.xpose.msk.msra.mxu1 %vm79_vm0, %v51_v40 }
  0x36   :  { %427 = vmatpush.xpose.msk.msra.mxu2 %vm79_vm0, %v65_v23 }
  0x37   :  { %392 = vmatpush.xpose.msk.msra.mxu0 %vm79_vm0, %v34_v41 }
  0x38   :  { %409 = vmatpush.xpose.msk.msra.mxu1 %vm79_vm0, %v50_v42 }
  0x3a   :  { %428 = vmatpush.xpose.msk.msra.mxu2 %vm79_vm0, %v64_v26 }
  0x3b   :  { %393 = vmatpush.xpose.msk.msra.mxu0 %vm79_vm0, %v33_v43 }
  0x3c   :  { %410 = vmatpush.xpose.msk.msra.mxu1 %vm79_vm0, %v49_v44 }
  0x3e   :  { %429 = vmatpush.xpose.msk.msra.mxu2 %vm79_vm0, %v63_v29 }
  0x3f   :  { %394 = vmatpush.xpose.msk.msra.mxu0 %vm79_vm0, %v32_v50 }
  0x40   :  { %411 = vmatpush.xpose.msk.msra.mxu1 %vm79_vm0, %v48_v51 }
  0x41   :  { %430 = vmatmul.msk.f32.vlgmr.msra.gmra.mxu2 %vm79_vm0, %v30_v32 }
  0x43   :  { %395 = vmatpush.xpose.msk.msra.mxu0 %vm79_vm0, %v31_v52 }
  0x44   :  { %412 = vmatpush.xpose.msk.msra.mxu1 %vm79_vm0, %v47_v53 }
  0x46   :  { %396 = vmatmul.msk.f32.vlgmr.msra.gmra.mxu0 %vm79_vm0, %v30_v32 }
  0x47   :  { %413 = vmatmul.msk.f32.vlgmr.msra.gmra.mxu1 %vm79_vm0, %v30_v32 }
  0xc3   :  { %v244_v2 = vpop.f32.mrf.mxu0 }
  0xc4   :  { %v284_v54 = vpop.f32.mrf.mxu2  ;;  %v287_v3 = vmul.f32 0.17677669, %v244_v2  ;;  %v264_v4 = vpop.f32.mrf.mxu1 }
  0xc5   :  { %v293_v56 = vsel %vm292_vm3, 1.0, %v284_v54  ;;  %289 = vst [vmem:[#allocation6] sm:$0xff] %v264_v4 }
  0xc6   :  { %v324_v57 = vrot.slane %v293_v56, 4  ;;  %318 = vmatpush.msra.mxu3 %v293_v56  ;;  %288 = vst [vmem:[#allocation4] sm:$0xff] %v287_v3  ;;  %353 = dma.vmem_to_hbm [thread:$0]  %s349_s0, 128, %s351_s10, [#allocation7]  }
  0xc7   :  { %431 = vmatmul.msk.f32.vlgmr.msra.gmra.mxu3 %vm28_vm2, %v295_v55  ;;  %342 = dma.vmem_to_hbm [thread:$0]  %s338_s12, 128, %s340_s15, [#allocation5]  }
  0xc8   :  { %v325_v58 = vadd.f32 %v324_v57, %v293_v56 }
  0xca   :  { %v326_v59 = vrot.slane %v325_v58, 2 }
  0xcc   :  { %v327_v60 = vadd.f32 %v326_v59, %v325_v58 }
  0xce   :  { %v328_v61 = vrot.slane %v327_v60, 1 }
  0xd0   :  { %v329_v63 = vadd.f32 %v328_v61, %v327_v60 }
  0xd2   :  { %v330_v1 = vadd.f32 %v329_v63, %v294_v62 }
  0xd4   :  { %331 = vst [vmem:[#allocation2] sm:$0x1] %v330_v1 }
 0x14a   :  { %v320_v5 = vpop.f32.mrf.mxu3 }
 0x14b   :  { %v321_v6 = vadd.f32 %v436_v0, %v320_v5 }
 0x14d   :  { %323 = vst [vmem:[#allocation8] sm:$0xff] %v321_v6 }
 0x14e   :  { %364 = dma.vmem_to_hbm [thread:$0]  %s360_s17, 128, %s362_s19, [#allocation7]  }
 0x14f   :  { %509 = dma.done.wait [#allocation5], 128  }
 0x150   :  { %510 = vsyncadd [#allocation5], 4294967168 }
 0x151   :  { %511 = dma.done.wait [#allocation7], 256  }
 0x152   :  { %512 = vsyncadd [#allocation7], 4294967040 }
 0x153   :  { %377 = vsyncpa [#allocation5], 1 }
 0x154   :  { %378 = vsyncpa [#allocation7], 1 }

</bundles_post_ra>
